<compile_context>
chip_gen: v7x
topology: tpu7x:2x2x1
jax: 0.10.0
libtpu: 0.0.40
codegen_flags: <defaults>
</compile_context>

<pallas_src>
import math
import functools

import jax
import jax.numpy as jnp
from jax.experimental import pallas as pl
from jax.experimental.pallas import tpu as pltpu


def _round_up8(r):
    return (r + 7) // 8 * 8


def _mha_kernel(x_ref, params_ref, o_ref, *, B, T, V, H,
                off_wqkv, off_bqkv, off_wout, off_bout, off_mask):
    """Fused multi-head self-attention + residual + relu, single grid-less invocation.

    Ref shapes:
      x_ref      : (N, V)      flat rows of the NCHW buffer, N = B*T
      params_ref : (rows, W)   f32 parameter slab (layout built in the wrapper,
                               all row offsets 8-aligned so slices stay tile-aligned)
      o_ref      : (N, V)
    """
    N = B * T
    hd = V // H

    x_f32 = x_ref[...].astype(jnp.float32)          # residual path stays f32
    x_bf = x_f32.astype(jnp.bfloat16)               # MXU input

    # Static slab slices (loads straight from VMEM, 8-aligned row offsets).
    w_qkv = params_ref[off_wqkv:off_wqkv + V, 0:3 * V].astype(jnp.bfloat16)   # (V, 3V)
    b_qkv = params_ref[off_bqkv:off_bqkv + 1, 0:3 * V]                        # (1, 3V) f32
    w_out = params_ref[off_wout:off_wout + V, 0:V].astype(jnp.bfloat16)       # (V, V)
    b_out = params_ref[off_bout:off_bout + 1, 0:V]                            # (1, V)  f32
    mask_bias = params_ref[off_mask:off_mask + N, 0:N]                        # (N, N)  f32

    # Fused QKV projection: one MXU push. 1/sqrt(hd) already folded into the q columns.
    qkv = jnp.dot(x_bf, w_qkv, preferred_element_type=jnp.float32) + b_qkv    # (N, 3V)

    oh = []
    for h in range(H):                               # static unroll, H == 2
        q = qkv[:, h * hd:(h + 1) * hd].astype(jnp.bfloat16)                  # (N, hd)
        k = qkv[:, V + h * hd:V + (h + 1) * hd].astype(jnp.bfloat16)          # (N, hd)
        v = qkv[:, 2 * V + h * hd:2 * V + (h + 1) * hd].astype(jnp.bfloat16)  # (N, hd)

        # scores: q @ k.T via dimension_numbers (no materialized transpose)
        s = jax.lax.dot_general(q, k, (((1,), (1,)), ((), ())),
                                preferred_element_type=jnp.float32)           # (N, N)
        s = s + mask_bias                            # additive group mask (vadd)
        s = s - jnp.max(s, axis=-1, keepdims=True)
        p = jnp.exp(s)
        p = p / jnp.sum(p, axis=-1, keepdims=True)   # exact divide -> tight numerics
        oh.append(jnp.dot(p.astype(jnp.bfloat16), v,
                          preferred_element_type=jnp.float32))                # (N, hd)

    # Fused output projection: concat heads, one matmul against out_proj.weight.T.
    oh_all = jnp.concatenate(oh, axis=-1).astype(jnp.bfloat16)                # (N, V)
    y = jnp.dot(oh_all, w_out, preferred_element_type=jnp.float32) + b_out    # (N, V)

    o_ref[...] = jnp.maximum(x_f32 + y, 0.0).astype(o_ref.dtype)              # residual+relu


def multihead_attention_forward(x, in_proj_w, in_proj_b, out_proj_w, out_proj_b,
                                num_heads=2):
    """x: (B, 1, T, V) NCHW; weights in PyTorch nn.MultiheadAttention convention."""
    B, C, T, V = x.shape
    assert C == 1 and V % num_heads == 0
    H = num_heads
    hd = V // H
    N = B * T
    scale = 1.0 / math.sqrt(hd)
    f32 = jnp.float32

    # ---- wrapper-side parameter prep (tiny, done once per call / traceable) ----
    # Fold 1/sqrt(hd) into the q columns of the fused QKV weight & bias.
    col_scale = jnp.concatenate([jnp.full((V,), scale, f32), jnp.ones((2 * V,), f32)])
    w_qkv = in_proj_w.astype(f32).T * col_scale[None, :]     # (V, 3V)
    b_qkv = in_proj_b.astype(f32) * col_scale                # (3V,)
    w_out = out_proj_w.astype(f32).T                         # (V, V)
    b_out = out_proj_b.astype(f32)                           # (V,)

    # Attention-group additive mask: under x.view(T, B, V), flat row r has
    # batch column (r % B) and attends only within its group.
    ri = jnp.arange(N)[:, None]
    ci = jnp.arange(N)[None, :]
    mask_bias = jnp.where((ri % B) == (ci % B), 0.0, -1e30).astype(f32)

    # Pack everything into ONE lane-padded f32 slab (2 input DMAs total incl. x).
    off_wqkv = 0
    off_bqkv = _round_up8(off_wqkv + V)
    off_wout = _round_up8(off_bqkv + 1)
    off_bout = _round_up8(off_wout + V)
    off_mask = _round_up8(off_bout + 1)
    rows = _round_up8(off_mask + N)
    width = max(3 * V, N)

    slab = jnp.zeros((rows, width), f32)
    slab = slab.at[off_wqkv:off_wqkv + V, 0:3 * V].set(w_qkv)
    slab = slab.at[off_bqkv, 0:3 * V].set(b_qkv)
    slab = slab.at[off_wout:off_wout + V, 0:V].set(w_out)
    slab = slab.at[off_bout, 0:V].set(b_out)
    slab = slab.at[off_mask:off_mask + N, 0:N].set(mask_bias)

    # Flat row matrix of the NCHW buffer (pure reshape — same as torch .view).
    x_flat = x.reshape(N, V)

    kernel = functools.partial(
        _mha_kernel, B=B, T=T, V=V, H=H,
        off_wqkv=off_wqkv, off_bqkv=off_bqkv, off_wout=off_wout,
        off_bout=off_bout, off_mask=off_mask)

    flops = 2 * N * V * (3 * V) + 4 * N * N * V + 2 * N * V * V
    transcendentals = H * N * N
    bytes_accessed = 2 * N * V * 4 + rows * width * 4

    out_flat = pl.pallas_call(
        kernel,
        out_shape=jax.ShapeDtypeStruct((N, V), x.dtype),
        in_specs=[pl.BlockSpec(memory_space=pltpu.MemorySpace.VMEM),
                  pl.BlockSpec(memory_space=pltpu.MemorySpace.VMEM)],
        out_specs=pl.BlockSpec(memory_space=pltpu.MemorySpace.VMEM),
        cost_estimate=pl.CostEstimate(
            flops=int(flops),
            transcendentals=int(transcendentals),
            bytes_accessed=int(bytes_accessed),
        ),
    )(x_flat, slab)

    return out_flat.reshape(B, 1, T, V)              # same as torch .view back to NCHW


def _reference_forward(x, in_proj_w, in_proj_b, out_proj_w, out_proj_b, num_heads=2):
    """Pure-JAX reference replicating torch.nn.MultiheadAttention semantics."""
    B, _, T, V = x.shape
    hd = V // num_heads
    scale = 1.0 / math.sqrt(hd)

    x1 = x.reshape(T, B, V)
    qkv = x1 @ in_proj_w.T + in_proj_b                     # (T, B, 3V)
    q, k, v = jnp.split(qkv, 3, axis=-1)

    def to_heads(t):
        return jnp.transpose(t.reshape(T, B * num_heads, hd), (1, 0, 2))

    qh, kh, vh = to_heads(q) * scale, to_heads(k), to_heads(v)   # (B*H, T, hd)
    s = jnp.einsum('bld,bmd->blm', qh, kh)
    p = jax.nn.softmax(s, axis=-1)
    o = jnp.einsum('blm,bmd->bld', p, vh)                  # (B*H, T, hd)
    o = jnp.transpose(o, (1, 0, 2)).reshape(T, B, V)
    y = o @ out_proj_w.T + out_proj_b                      # (T, B, V)
    y = y.reshape(B, 1, T, V)
    return jnp.maximum(x + y, 0.0)


if __name__ == "__main__":
    B = 2            # batch_size
    V = 16           # n_vertice == embed_dim (divisible by num_heads=2)
    T = 8            # n_his
    H = 2            # num_heads (fixed in the module)

    key = jax.random.PRNGKey(0)
    k1, k2, k3, k4, kx = jax.random.split(key, 5)

    # Deterministic synthetic parameters (PyTorch MHA parameter shapes)
    in_proj_w = jax.random.normal(k1, (3 * V, V), jnp.float32) * 0.1   # in_proj_weight
    in_proj_b = jax.random.normal(k2, (3 * V,), jnp.float32) * 0.1     # in_proj_bias
    out_proj_w = jax.random.normal(k3, (V, V), jnp.float32) * 0.1      # out_proj.weight
    out_proj_b = jax.random.normal(k4, (V,), jnp.float32) * 0.1        # out_proj.bias

    x = jax.random.normal(kx, (B, 1, T, V), jnp.float32)               # NCHW input

    out = multihead_attention_forward(x, in_proj_w, in_proj_b,
                                      out_proj_w, out_proj_b, num_heads=H)
    out = jax.block_until_ready(out)

    ref = _reference_forward(x, in_proj_w, in_proj_b, out_proj_w, out_proj_b,
                             num_heads=H)
    assert out.shape == (B, 1, T, V)
    # Softmax divide is exact again; remaining deviation comes only from the bf16 MXU
    # inputs (f32 accumulation), so a 1e-2 abs/rel tolerance is comfortable here.
    assert jnp.allclose(out, ref, atol=1e-2, rtol=1e-2), "mismatch vs reference"

    print("KERNEL_OK")
</pallas_src>

<mosaic_0001>
module attributes {stable_mosaic.version = 11 : i64} {
  func.func @_mha_kernel(%arg0: memref<16x16xf32, #tpu.memory_space<vmem>>, %arg1: memref<64x48xf32, #tpu.memory_space<vmem>>, %arg2: memref<16x16xf32, #tpu.memory_space<vmem>>) attributes {dimension_semantics = [], scalar_prefetch = 0 : i64, scratch_operands = 0 : i64, tpu.core_type = #tpu.core_type<tc>} {
    %c0 = arith.constant 0 : index
    %c0_0 = arith.constant 0 : index
    %0 = vector.load %arg0[%c0, %c0_0] : memref<16x16xf32, #tpu.memory_space<vmem>>, vector<16x16xf32>
    %1 = arith.truncf %0 : vector<16x16xf32> to vector<16x16xbf16>
    %c0_1 = arith.constant 0 : index
    %c0_2 = arith.constant 0 : index
    %2 = vector.load %arg1[%c0_1, %c0_2] : memref<64x48xf32, #tpu.memory_space<vmem>>, vector<16x48xf32>
    %3 = arith.truncf %2 : vector<16x48xf32> to vector<16x48xbf16>
    %c16 = arith.constant 16 : index
    %c0_3 = arith.constant 0 : index
    %4 = vector.load %arg1[%c16, %c0_3] : memref<64x48xf32, #tpu.memory_space<vmem>>, vector<1x48xf32>
    %c24 = arith.constant 24 : index
    %c0_4 = arith.constant 0 : index
    %5 = vector.load %arg1[%c24, %c0_4] : memref<64x48xf32, #tpu.memory_space<vmem>>, vector<16x16xf32>
    %6 = arith.truncf %5 : vector<16x16xf32> to vector<16x16xbf16>
    %c40 = arith.constant 40 : index
    %c0_5 = arith.constant 0 : index
    %7 = vector.load %arg1[%c40, %c0_5] : memref<64x48xf32, #tpu.memory_space<vmem>>, vector<1x16xf32>
    %c48 = arith.constant 48 : index
    %c0_6 = arith.constant 0 : index
    %8 = vector.load %arg1[%c48, %c0_6] : memref<64x48xf32, #tpu.memory_space<vmem>>, vector<16x16xf32>
    %cst = arith.constant dense<0.000000e+00> : vector<16x48xf32>
    %9 = tpu.matmul %1, %3, %cst {dimension_numbers = #tpu.dot_dimension_numbers<[1], [0], [0], [1], [0, 0, 1, 1], [], []>} : vector<16x16xbf16>, vector<16x48xbf16>, vector<16x48xf32> -> vector<16x48xf32>
    %10 = vector.broadcast %4 : vector<1x48xf32> to vector<16x48xf32>
    %11 = arith.addf %9, %10 : vector<16x48xf32>
    %12 = vector.extract_strided_slice %11 {offsets = [0, 0], sizes = [16, 8], strides = [1, 1]} : vector<16x48xf32> to vector<16x8xf32>
    %13 = arith.truncf %12 : vector<16x8xf32> to vector<16x8xbf16>
    %14 = vector.extract_strided_slice %11 {offsets = [0, 16], sizes = [16, 8], strides = [1, 1]} : vector<16x48xf32> to vector<16x8xf32>
    %15 = arith.truncf %14 : vector<16x8xf32> to vector<16x8xbf16>
    %16 = vector.extract_strided_slice %11 {offsets = [0, 32], sizes = [16, 8], strides = [1, 1]} : vector<16x48xf32> to vector<16x8xf32>
    %17 = arith.truncf %16 : vector<16x8xf32> to vector<16x8xbf16>
    %cst_7 = arith.constant dense<0.000000e+00> : vector<16x16xf32>
    %18 = tpu.matmul %13, %15, %cst_7 {dimension_numbers = #tpu.dot_dimension_numbers<[1], [1], [0], [0], [0, 0, 1, 0], [], []>} : vector<16x8xbf16>, vector<16x8xbf16>, vector<16x16xf32> -> vector<16x16xf32>
    %19 = arith.addf %18, %8 : vector<16x16xf32>
    %cst_8 = arith.constant dense<0xFF800000> : vector<16xf32>
    %20 = vector.multi_reduction <maximumf>, %19, %cst_8 [1] : vector<16x16xf32> to vector<16xf32>
    %21 = vector.shape_cast %20 : vector<16xf32> to vector<16x1xf32>
    %22 = vector.broadcast %21 : vector<16x1xf32> to vector<16x16xf32>
    %23 = arith.subf %19, %22 : vector<16x16xf32>
    %24 = math.exp %23 : vector<16x16xf32>
    %cst_9 = arith.constant dense<0.000000e+00> : vector<16xf32>
    %25 = vector.multi_reduction <add>, %24, %cst_9 [1] : vector<16x16xf32> to vector<16xf32>
    %26 = vector.shape_cast %25 : vector<16xf32> to vector<16x1xf32>
    %27 = vector.broadcast %26 : vector<16x1xf32> to vector<16x16xf32>
    %28 = arith.divf %24, %27 : vector<16x16xf32>
    %29 = arith.truncf %28 : vector<16x16xf32> to vector<16x16xbf16>
    %cst_10 = arith.constant dense<0.000000e+00> : vector<16x8xf32>
    %30 = tpu.matmul %29, %17, %cst_10 {dimension_numbers = #tpu.dot_dimension_numbers<[1], [0], [0], [1], [0, 0, 1, 1], [], []>} : vector<16x16xbf16>, vector<16x8xbf16>, vector<16x8xf32> -> vector<16x8xf32>
    %31 = vector.extract_strided_slice %11 {offsets = [0, 8], sizes = [16, 8], strides = [1, 1]} : vector<16x48xf32> to vector<16x8xf32>
    %32 = arith.truncf %31 : vector<16x8xf32> to vector<16x8xbf16>
    %33 = vector.extract_strided_slice %11 {offsets = [0, 24], sizes = [16, 8], strides = [1, 1]} : vector<16x48xf32> to vector<16x8xf32>
    %34 = arith.truncf %33 : vector<16x8xf32> to vector<16x8xbf16>
    %35 = vector.extract_strided_slice %11 {offsets = [0, 40], sizes = [16, 8], strides = [1, 1]} : vector<16x48xf32> to vector<16x8xf32>
    %36 = arith.truncf %35 : vector<16x8xf32> to vector<16x8xbf16>
    %cst_11 = arith.constant dense<0.000000e+00> : vector<16x16xf32>
    %37 = tpu.matmul %32, %34, %cst_11 {dimension_numbers = #tpu.dot_dimension_numbers<[1], [1], [0], [0], [0, 0, 1, 0], [], []>} : vector<16x8xbf16>, vector<16x8xbf16>, vector<16x16xf32> -> vector<16x16xf32>
    %38 = arith.addf %37, %8 : vector<16x16xf32>
    %cst_12 = arith.constant dense<0xFF800000> : vector<16xf32>
    %39 = vector.multi_reduction <maximumf>, %38, %cst_12 [1] : vector<16x16xf32> to vector<16xf32>
    %40 = vector.shape_cast %39 : vector<16xf32> to vector<16x1xf32>
    %41 = vector.broadcast %40 : vector<16x1xf32> to vector<16x16xf32>
    %42 = arith.subf %38, %41 : vector<16x16xf32>
    %43 = math.exp %42 : vector<16x16xf32>
    %cst_13 = arith.constant dense<0.000000e+00> : vector<16xf32>
    %44 = vector.multi_reduction <add>, %43, %cst_13 [1] : vector<16x16xf32> to vector<16xf32>
    %45 = vector.shape_cast %44 : vector<16xf32> to vector<16x1xf32>
    %46 = vector.broadcast %45 : vector<16x1xf32> to vector<16x16xf32>
    %47 = arith.divf %43, %46 : vector<16x16xf32>
    %48 = arith.truncf %47 : vector<16x16xf32> to vector<16x16xbf16>
    %cst_14 = arith.constant dense<0.000000e+00> : vector<16x8xf32>
    %49 = tpu.matmul %48, %36, %cst_14 {dimension_numbers = #tpu.dot_dimension_numbers<[1], [0], [0], [1], [0, 0, 1, 1], [], []>} : vector<16x16xbf16>, vector<16x8xbf16>, vector<16x8xf32> -> vector<16x8xf32>
    %50 = tpu.concatenate %30, %49 in 1 : vector<16x8xf32>, vector<16x8xf32> -> vector<16x16xf32>
    %51 = arith.truncf %50 : vector<16x16xf32> to vector<16x16xbf16>
    %cst_15 = arith.constant dense<0.000000e+00> : vector<16x16xf32>
    %52 = tpu.matmul %51, %6, %cst_15 {dimension_numbers = #tpu.dot_dimension_numbers<[1], [0], [0], [1], [0, 0, 1, 1], [], []>} : vector<16x16xbf16>, vector<16x16xbf16>, vector<16x16xf32> -> vector<16x16xf32>
    %53 = vector.broadcast %7 : vector<1x16xf32> to vector<16x16xf32>
    %54 = arith.addf %52, %53 : vector<16x16xf32>
    %55 = arith.addf %0, %54 : vector<16x16xf32>
    %cst_16 = arith.constant 0.000000e+00 : f32
    %56 = vector.broadcast %cst_16 : f32 to vector<16x16xf32>
    %57 = arith.maximumf %55, %56 : vector<16x16xf32>
    %c0_17 = arith.constant 0 : index
    %c0_18 = arith.constant 0 : index
    %58 = vector.load %arg2[%c0_17, %c0_18] : memref<16x16xf32, #tpu.memory_space<vmem>>, vector<16x16xf32>
    tpu.vector_store %arg2[%c0_17, %c0_18], %57 {strides = array<i32>} : memref<16x16xf32, #tpu.memory_space<vmem>>, vector<16x16xf32>,
    return
  }
}

</mosaic_0001>

<bundles_post_ra>
// kernel: tpu_custom_call.1
= control target key start
LH: loop header
LB: loop body
LE: loop exit
PB: predicated region body
PF: predicated region fallthrough
CT: control target
= control target key end

     0   :  { %v510_v3 = vmov 0.0   ;;  %vm511_vm0 = vmmov 0   ;;  %s633_s0 = inlined_call_operand.vmem [shape: f32[16,16], index: 0, kind: input, shape index: {}]   ;;  %s634_s1 = inlined_call_operand.vmem [shape: f32[64,48], index: 1, kind: input, shape index: {}]   ;;  %s635_s2 = inlined_call_operand.hbm [shape: f32[16,16], index: 2, kind: output, shape index: {}]  }
   0x1   :  { %v16_v0 = vld [vmem:[%s634_s1] sm:$0xff]  ;;  %v17_v1 = vld [vmem:[%s634_s1 + $0x8] sm:$0xff]  ;;  %419 = vmatprep.subr.bf16.mxu0 %v510_v3  ;;  %421 = vmatprep.mubr.msk.bf16.mxu0 %vm511_vm0, %v510_v3 }
   0x2   :  { %v544_v2 = vld [vmem:[%s633_s0] sm:$0xff]  ;;  %v18_v4 = vpack.c.bf16 %v17_v1, %v16_v0  ;;  %v552_v5 = vld [vmem:[%s633_s0 + $0x8] sm:$0xff] }
   0x3   :  { %7 = vsyncpa [#allocation3], 0  ;;  %v15_v6 = vpack.c.bf16 %v552_v5, %v544_v2  ;;  %425 = vmatprep.subr.bf16.mxu1 %v510_v3  ;;  %427 = vmatprep.mubr.msk.bf16.mxu1 %vm511_vm0, %v510_v3  ;;  %vm30_vm1 = vcmask 130048   ;;  %v399_v7 = vld [vmem:[%s634_s1 + $0x10] ss:$0 sm:$0xff]  ;;  %s512_s18 = smov 120  }
   0x4   :  { %420 = vmatpush3.bf16.msra.mxu0 %v18_v4  ;;  %s513_s19 = smov 112   ;;  %s514_s20 = smov 104   ;;  %vm79_vm2 = vcmask 64512   ;;  %v24_v20 = vld [vmem:[%s634_s1 + $0x30] sm:$0xff]  ;;  %v25_v22 = vld [vmem:[%s634_s1 + $0x38] sm:$0xff] }
   0x5   :  { %431 = vmatprep.subr.bf16.mxu0 %v510_v3  ;;  %s515_s25 = smov 88   ;;  %s516_s26 = smov 96  }
   0x6   :  { %s517_s3 = smov 8   ;;  %s518_s6 = smov [#allocation2]  }
   0x7   :  { %422 = vmatmul.mubr.msk.bf16.vlgmr.msra.gmra.mrb[0].mxu0 %vm30_vm1, %v15_v6  ;;  %s388_s7 = sshll.u32 %s518_s6, 4  ;;  %s389_s7 = int_to_ptr.vmem [resolvable:$true] %s388_s7 }
   0x8   :  { %433 = vmatprep.mubr.msk.bf16.mxu0 %vm511_vm0, %v510_v3  ;;  %p491_p1 = scmp.lt.s32.totalorder %s389_s7, %s389_s7 }
  0xda   :  { %v68_v8 = vpop.f32.mrb[0].mxu0 }
  0xdb   :  { %v423_v9 = vpop.f32.mrb[1].mxu0  ;;  %v69_v11 = vadd.f32 %v399_v7, %v68_v8 }
  0xdc   :  { %v71_v10 = vpop.f32.mrb[2].mxu0 }
  0xdd   :  { %v72_v12 = vadd.f32 %v399_v7, %v71_v10  ;;  %v424_v13 = vpop.f32.mrb[3].mxu0 }
  0xdf   :  { %v566_v14 = vpack.c.bf16 %v72_v12, %v69_v11 }
  0xe1   :  { %197 = vrot.lane.b32.xlu1 %v566_v14, %s512_s18  ;;  %77 = vrot.lane.b32.xlu0 %v566_v14, %s513_s19 }
  0xe5   :  { %199 = vrot.lane.b32.xlu0 %v566_v14, %s514_s20 }
 0x153   :  { %v78_v15 = vpop.permute.xlu0 %77  ;;  %v198_v19 = vpop.permute.xlu1 %197 }
 0x154   :  { %v84_v16 = vsel %vm79_vm2, %v78_v15, 0  ;;  %v21_v15 = vld [vmem:[%s634_s1 + $0x20] sm:$0xff] }
 0x155   :  { %426 = vmatpush3.bf16.xpose.msra.mxu1 %v84_v16 }
 0x156   :  { %437 = vmatprep.subr.bf16.mxu1 %v510_v3 }
 0x157   :  { %v200_v17 = vpop.permute.xlu0 %199 }
 0x158   :  { %v205_v18 = vsel %vm79_vm2, %v200_v17, 0 }
 0x15c   :  { %428 = vmatmul.mubr.msk.bf16.vlgmr.msra.gmra.mrb[0].mxu1 %vm79_vm2, %v566_v14 }
 0x15d   :  { %438 = vmatpush3.bf16.xpose.msra.mxu1 %v205_v18  ;;  %439 = vmatprep.mubr.msk.bf16.mxu1 %vm511_vm0, %v510_v3 }
 0x15e   :  { %449 = vmatprep.subr.bf16.mxu1 %v510_v3 }
 0x164   :  { %440 = vmatmul.mubr.msk.bf16.vlgmr.msra.gmra.mrb[4].mxu1 %vm79_vm2, %v198_v19 }
 0x165   :  { %451 = vmatprep.mubr.msk.bf16.mxu1 %vm511_vm0, %v510_v3 }
 0x22f   :  { %v120_v21 = vpop.f32.mrb[0].mxu1 }
 0x230   :  { %v121_v23 = vadd.f32 %v120_v21, %v24_v20  ;;  %v429_v24 = vpop.f32.mrb[1].mxu1 }
 0x231   :  { %v123_v25 = vpop.f32.mrb[2].mxu1 }
 0x232   :  { %v124_v26 = vadd.f32 %v123_v25, %v25_v22  ;;  %v430_v27 = vpop.f32.mrb[3].mxu1  ;;  %v127_v28 = vsel %vm30_vm1, %v121_v23, -inf }
 0x233   :  { %128 = vmax.xlane.f32.xlu1 %v127_v28 }
 0x234   :  { %v130_v29 = vsel %vm30_vm1, %v124_v26, -inf }
 0x235   :  { %131 = vmax.xlane.f32.xlu0 %v130_v29 }
 0x237   :  { %v241_v30 = vpop.f32.mrb[4].mxu1 }
 0x238   :  { %v242_v31 = vadd.f32 %v241_v30, %v24_v20  ;;  %v441_v32 = vpop.f32.mrb[5].mxu1  ;;  %v405_v30 = vld [vmem:[%s634_s1 + $0x28] ss:$0 sm:$0xff] }
 0x239   :  { %v244_v33 = vpop.f32.mrb[6].mxu1 }
 0x23a   :  { %v245_v34 = vadd.f32 %v244_v33, %v25_v22  ;;  %v442_v35 = vpop.f32.mrb[7].mxu1  ;;  %v248_v36 = vsel %vm30_vm1, %v242_v31, -inf }
 0x23b   :  { %249 = vmax.xlane.f32.xlu0 %v248_v36 }
 0x23c   :  { %v251_v37 = vsel %vm30_vm1, %v245_v34, -inf }
 0x23d   :  { %252 = vmax.xlane.f32.xlu1 %v251_v37 }
 0x2c0   :  { %v129_v38 = vpop.xlane.xlu1 %128 }
 0x2c1   :  { %v133_v39 = vsub.f32 %v121_v23, %v129_v38 }
 0x2c2   :  { %v132_v40 = vpop.xlane.xlu0 %131 }
 0x2c3   :  { %v135_v41 = vmul.f32 1.442695, %v133_v39  ;;  %v134_v42 = vsub.f32 %v124_v26, %v132_v40 }
 0x2c5   :  { %470 = vpow2.f32 %v135_v41  ;;  %v137_v43 = vmul.f32 1.442695, %v134_v42 }
 0x2c7   :  { %472 = vpow2.f32 %v137_v43 }
 0x2c8   :  { %v250_v44 = vpop.xlane.xlu0 %249 }
 0x2c9   :  { %v254_v45 = vsub.f32 %v242_v31, %v250_v44 }
 0x2ca   :  { %v253_v46 = vpop.xlane.xlu1 %252 }
 0x2cb   :  { %v256_v47 = vmul.f32 1.442695, %v254_v45  ;;  %v255_v48 = vsub.f32 %v245_v34, %v253_v46 }
 0x2cd   :  { %474 = vpow2.f32 %v256_v47  ;;  %v258_v49 = vmul.f32 1.442695, %v255_v48 }
 0x2cf   :  { %v471_v50 = vpop.eup %470  ;;  %476 = vpow2.f32 %v258_v49 }
 0x2d0   :  { %v139_v51 = vsel %vm30_vm1, %v471_v50, 0.0 }
 0x2d1   :  { %v473_v52 = vpop.eup %472  ;;  %140 = vadd.xlane.f32.xlu0 %v139_v51 }
 0x2d2   :  { %v142_v53 = vsel %vm30_vm1, %v473_v52, 0.0 }
 0x2d3   :  { %143 = vadd.xlane.f32.xlu1 %v142_v53 }
 0x2d7   :  { %v475_v54 = vpop.eup %474 }
 0x2d8   :  { %v260_v55 = vsel %vm30_vm1, %v475_v54, 0.0 }
 0x2d9   :  { %v477_v56 = vpop.eup %476  ;;  %261 = vadd.xlane.f32.xlu0 %v260_v55 }
 0x2da   :  { %v263_v57 = vsel %vm30_vm1, %v477_v56, 0.0 }
 0x2db   :  { %264 = vadd.xlane.f32.xlu1 %v263_v57 }
 0x2ec   :  { %271 = vrot.lane.b32.xlu1 %v566_v14, %s515_s25 }
 0x2ef   :  { %150 = vrot.lane.b32.xlu0 %v566_v14, %s516_s26  ;;  %v20_v14 = vld [vmem:[%s634_s1 + $0x18] sm:$0xff]  ;;  %s486_s1 = scalar_lea.vmem %s389_s7, 256 }
 0x2f0   :  { %v22_v17 = vpack.c.bf16 %v21_v15, %v20_v14  ;;  %p487_p0 = scmp.ne.s32.totalorder %s389_s7, %s486_s1  ;;  %p492_p2 = scmp.lt.s32.totalorder %s486_s1, %s486_s1 }
 0x2f2   :  { %450 = vmatpush3.bf16.msra.mxu1 %v22_v17  ;;  %p493_p3 = por %p492_p2, %p491_p1 }
 0x2f4   :  { %p494_p4 = pnand %p493_p3, %p487_p0 }
 0x35e   :  { %v141_v58 = vpop.xlane.xlu0 %140 }
 0x35f   :  { %478 = vrcp.f32 %v141_v58 }
 0x360   :  { %v144_v59 = vpop.xlane.xlu1 %143 }
 0x361   :  { %480 = vrcp.f32 %v144_v59 }
 0x366   :  { %v262_v60 = vpop.xlane.xlu0 %261 }
 0x367   :  { %482 = vrcp.f32 %v262_v60 }
 0x368   :  { %v265_v61 = vpop.xlane.xlu1 %264 }
 0x369   :  { %v479_v62 = vpop.eup %478  ;;  %484 = vrcp.f32 %v265_v61 }
 0x36a   :  { %v151_v63 = vpop.permute.xlu0 %150  ;;  %v146_v1 = vmul.f32 %v479_v62, %v471_v50 }
 0x36b   :  { %v481_v0 = vpop.eup %480  ;;  %432 = vmatpush3.bf16.msra.mxu0 %v151_v63 }
 0x36c   :  { %v148_v4 = vmul.f32 %v481_v0, %v473_v52  ;;  %443 = vmatprep.subr.bf16.mxu0 %v510_v3  ;;  %v272_v7 = vpop.permute.xlu1 %271 }
 0x36e   :  { %v149_v6 = vpack.c.bf16 %v148_v4, %v146_v1 }
 0x370   :  { %434 = vmatmul.mubr.msk.bf16.vlgmr.msra.gmra.mrb[4].mxu0 %vm30_vm1, %v149_v6 }
 0x371   :  { %v483_v8 = vpop.eup %482  ;;  %444 = vmatpush3.bf16.msra.mxu0 %v272_v7  ;;  %445 = vmatprep.mubr.msk.bf16.mxu0 %vm511_vm0, %v510_v3 }
 0x372   :  { %v267_v10 = vmul.f32 %v483_v8, %v475_v54 }
 0x373   :  { %v485_v9 = vpop.eup %484 }
 0x374   :  { %v269_v11 = vmul.f32 %v485_v9, %v477_v56 }
 0x376   :  { %v270_v12 = vpack.c.bf16 %v269_v11, %v267_v10 }
 0x378   :  { %446 = vmatmul.mubr.msk.bf16.vlgmr.msra.gmra.mrb[8].mxu0 %vm30_vm1, %v270_v12 }
 0x443   :  { %v190_v13 = vpop.f32.mrb[4].mxu0 }
 0x444   :  { %v435_v16 = vpop.f32.mrb[5].mxu0 }
 0x445   :  { %v193_v18 = vpop.f32.mrb[6].mxu0 }
 0x446   :  { %v436_v19 = vpop.f32.mrb[7].mxu0 }
 0x44b   :  { %v311_v3 = vpop.f32.mrb[8].mxu0 }
 0x44c   :  { %v447_v20 = vpop.f32.mrb[9].mxu0 }
 0x44d   :  { %v314_v21 = vpop.f32.mrb[10].mxu0 }
 0x44e   :  { %v465_v22 = vpack.i.bf16 %v314_v21, %v311_v3  ;;  %v448_v23 = vpop.f32.mrb[11].mxu0 }
 0x450   :  { %466 = vrot.lane.b32.xlu1 %v465_v22, %s517_s3 }
 0x4c2   :  { %v467_v24 = vpop.permute.xlu1 %466 }
 0x4c3   :  { %v469_v25 = vunpack.i.h.bf16 %v467_v24  ;;  %v468_v26 = vunpack.i.l.bf16 %v467_v24 }
 0x4c5   :  { %v327_v27 = vsel %vm79_vm2, %v193_v18, %v469_v25  ;;  %v326_v28 = vsel %vm79_vm2, %v190_v13, %v468_v26 }
 0x4c6   :  { %v328_v29 = vpack.c.bf16 %v327_v27, %v326_v28 }
 0x4c8   :  { %452 = vmatmul.mubr.msk.bf16.vlgmr.msra.gmra.mrb[8].mxu1 %vm30_vm1, %v328_v29 }
 0x59b   :  { %v370_v31 = vpop.f32.mrb[8].mxu1 }
 0x59c   :  { %v371_v32 = vadd.f32 %v405_v30, %v370_v31  ;;  %v453_v33 = vpop.f32.mrb[9].mxu1 }
 0x59d   :  { %v373_v34 = vpop.f32.mrb[10].mxu1 }
 0x59e   :  { %v377_v35 = vadd.f32 %v371_v32, %v544_v2  ;;  %v374_v36 = vadd.f32 %v405_v30, %v373_v34  ;;  %v454_v37 = vpop.f32.mrb[11].mxu1 }
 0x5a0   :  { %v379_v38 = vmax.f32 %v377_v35, 0.0  ;;  %v378_v39 = vadd.f32 %v374_v36, %v552_v5 }
 0x5a2   :  { %381 = vst.msk [vmem:[#allocation2] sm:$0xff] %vm30_vm1, %v379_v38  ;;  %v380_v40 = vmax.f32 %v378_v39, 0.0 }
 0x5a4   :  { %382 = vst.msk [vmem:[#allocation2 + $0x8] sm:$0xff] %vm30_vm1, %v380_v40 }
 0x5a5   :  { %497 = shalt.err (!%p494_p4)
}
 0x5a6   :  { %s498_s10 = scalar_lea.hbm %s635_s2, 256 }
 0x5a7   :  { %p499_p5 = scmp.ne.s32.totalorder %s635_s2, %s498_s10  ;;  %p502_p6 = scmp.lt.u32.totalorder %s498_s10, %s635_s2 }
 0x5a9   :  { %p504_p7 = pnand %p502_p6, %p499_p5 }
 0x5ab   :  { %507 = shalt.err (!%p504_p7)
}
 0x5ac   :  { %s519_s15 = smov 128  }
 0x5ad   :  { %394 = dma.vmem_to_hbm [thread:$0]  %s389_s7, 256, %s635_s2, [#allocation3], %s519_s15, %s519_s15, %s517_s3  }
 0x5ae   :  { %508 = dma.done.wait [#allocation3], 256  }
 0x5af   :  { %509 = vsyncadd [#allocation3], 4294967040 }
 0x5b0   :  { %398 = vsyncpa [#allocation3], 1 }

</bundles_post_ra>
